<compile_context>
chip_gen: v7x
topology: tpu7x:2x2x1
jax: 0.10.0
libtpu: 0.0.40
codegen_flags: <defaults>
</compile_context>

<pallas_src>
import jax
import jax.numpy as jnp
from jax.experimental import pallas as pl
from jax.experimental.pallas import tpu as pltpu


# ----------------------------- Pallas kernel ------------------------------ #
def kgrl_kernel(
    lhs_ref,       # (B, N+S+D+S+1) bf16  [dialog_sym_rep | sym_mask | dialog_state_ | 1]
    w_fuse_ref,    # (N+S+D+S+1, E+D+S+1+S) bf16  blockdiag(graph_rep, I, w_di) + biases
    w1b_ref,       # (E+D+S+1, 2H+1) bf16  blockdiag(w_sq1, w_mu1) + bias row + ones lane
    w2b_ref,       # (2H+1, S+1)     bf16  blockdiag(w_sq2, w_mu2) + bias row
    masks_ref,     # (B, 3S) f32  [disease_mask (S-wide) | sym_flag | symptoms_mask]
    sym_rwr_ref,   # (D, B, S) f32  RWR matrices (construct_graph stand-in)
    out_ref,       # (2, B, S) f32  [0]=disease_dis (S-wide), [1]=symptom_final
):
    f32 = jnp.float32
    bf16 = jnp.bfloat16

    D, B, S = sym_rwr_ref.shape
    X1 = w1b_ref.shape[0]            # E + D + S + 1 (packed layer-1 width incl. ones lane)

    # ---- fused MXU push #1: one block-diagonal matmul produces --------------
    #      lanes [0:X1)   = [state | dialog_state_ | 1]   (packed MLP input)
    #      lanes [X1:)    = DisInfer logits (S-wide, pad lanes ~ -1e9)
    fused1 = jnp.dot(lhs_ref[...], w_fuse_ref[...], preferred_element_type=f32)
    x1 = fused1[:, :X1]
    logits = fused1[:, X1:]

    # ---- DisInfer stub: softmax over the D real lanes (pad lanes underflow) --
    # TODO(synk): original DisInfer is an external module; deterministic
    # softmax-linear stand-in with the same output shape.
    m = jnp.max(logits, axis=-1, keepdims=True)
    e = jnp.exp(logits - m)                                   # pad lanes -> exactly 0
    disease_ = e * pl.reciprocal(jnp.sum(e, axis=-1, keepdims=True), approx=True)

    masks = masks_ref[...]
    disease_dis = disease_ * masks[:, 0:S]                    # (B, S); lanes [D:) == 0

    # ---- sym_rwr_prob: D unrolled VPU FMAs (no 3-D broadcast / XLU reduce) ---
    sym_rwr_prob = jnp.zeros((B, S), f32)
    for d in range(D):                                        # D is tiny & static
        sym_rwr_prob = sym_rwr_prob + disease_dis[:, d:d + 1] * sym_rwr_ref[d]

    # ---- filter_sig: sigmoid only where value > 0 ----------------------------
    sym_rwr_prob = jnp.where(sym_rwr_prob > 0.0,
                             jax.nn.sigmoid(sym_rwr_prob), sym_rwr_prob)

    # ---- MXU pushes #2/#3: packed [Sym_Inquiry | mu_] heads, biases folded ---
    h = jnp.maximum(
        jnp.dot(x1.astype(bf16), w1b_ref[...], preferred_element_type=f32), 0.0)
    gated = jax.nn.sigmoid(
        jnp.dot(h.astype(bf16), w2b_ref[...], preferred_element_type=f32))
    symptom_p = gated[:, :S]                                  # (B, S)
    mu = gated[:, S:S + 1]                                    # (B, 1)

    # ---- mu-gated mixture + masking ------------------------------------------
    sym_prob = mu * symptom_p + (1.0 - mu) * sym_rwr_prob
    symptom_final = sym_prob * masks[:, S:2 * S] * masks[:, 2 * S:3 * S]

    # ---- single output slab (one writeback DMA) ------------------------------
    out_ref[0] = disease_dis
    out_ref[1] = symptom_final


# ----------------------- once-per-session precompute ----------------------- #
def pack_session_params(params, kg_adj, *, num_dis, num_sym):
    """Batch-invariant packing, hoisted out of the per-call kernel.

    TODO(synk): original uses an external GAT GraphAgent; replaced by a
    deterministic tanh-linear encoder with the same output shape (N, E).
    """
    f32 = jnp.float32
    w_gat = params["w_gat"]
    w_di, b_di = params["w_di"], params["b_di"]
    w_sq1, b_sq1 = params["w_sq1"], params["b_sq1"]
    w_sq2, b_sq2 = params["w_sq2"], params["b_sq2"]
    w_mu1, b_mu1 = params["w_mu1"], params["b_mu1"]
    w_mu2, b_mu2 = params["w_mu2"], params["b_mu2"]

    N, E = w_gat.shape
    D, S = num_dis, num_sym
    H = w_sq1.shape[1]
    DS = D + S

    graph_rep = jnp.tanh(kg_adj @ w_gat)                      # (N, E), batch-invariant

    # Fused matmul #1 RHS:
    #   lhs = [dialog_sym_rep (N) | sym_mask (S) | dialog_state_ (D+S) | 1]
    #   out = [state (E) | dialog_state_ (D+S) | 1 | DisInfer logits (S-wide)]
    K1 = N + S + DS + 1
    P1 = E + DS + 1 + S
    w_fuse = jnp.zeros((K1, P1), f32)
    w_fuse = w_fuse.at[0:N, 0:E].set(graph_rep)
    w_fuse = w_fuse.at[N:N + S, E + DS + 1:E + DS + 1 + D].set(w_di)
    w_fuse = w_fuse.at[N + S:N + S + DS, E:E + DS].set(jnp.eye(DS, dtype=f32))
    w_fuse = w_fuse.at[K1 - 1, E + DS].set(1.0)               # ones lane -> layer-1 bias
    w_fuse = w_fuse.at[K1 - 1, E + DS + 1:E + DS + 1 + D].set(b_di[0])
    w_fuse = w_fuse.at[K1 - 1, E + DS + 1 + D:].set(-1e9)     # kill padded disease lanes

    # Layer 1: blockdiag(w_sq1, w_mu1) + bias row + ones output lane.
    w1b = jnp.zeros((E + DS + 1, 2 * H + 1), f32)
    w1b = w1b.at[0:E, 0:H].set(w_sq1)
    w1b = w1b.at[E:E + DS, H:2 * H].set(w_mu1)
    w1b = w1b.at[E + DS, 0:H].set(b_sq1[0])
    w1b = w1b.at[E + DS, H:2 * H].set(b_mu1[0])
    w1b = w1b.at[E + DS, 2 * H].set(1.0)                      # ones lane -> layer-2 bias

    # Layer 2: blockdiag(w_sq2, w_mu2) + bias row -> [symptom logits (S) | mu (1)].
    w2b = jnp.zeros((2 * H + 1, S + 1), f32)
    w2b = w2b.at[0:H, 0:S].set(w_sq2)
    w2b = w2b.at[H:2 * H, S].set(w_mu2[:, 0])
    w2b = w2b.at[2 * H, 0:S].set(b_sq2[0])
    w2b = w2b.at[2 * H, S].set(b_mu2[0, 0])

    bf16 = jnp.bfloat16
    return w_fuse.astype(bf16), w1b.astype(bf16), w2b.astype(bf16)


# ------------------------------- wrapper ----------------------------------- #
@jax.jit
def kgrl_forward(w_fuse, w1b, w2b, dialog_state, dialog_sym_rep,
                 sym_flag, sym_mask, disease_mask, symptoms_mask, sym_rwr):
    B, D = disease_mask.shape
    S = sym_flag.shape[1]

    # get_sym_mask: keep only exact +/-1 entries (matches the torch.where chain).
    ds = dialog_state
    dialog_state_ = ds * (jnp.abs(ds) == 1.0).astype(jnp.float32)

    # Packed fused-matmul LHS (single operand, single fusion):
    # [dialog_sym_rep | sym_mask | dialog_state_ | 1]  -- the trailing 1 drives
    # the bias rows of w_fuse; +/-1/0 values are exact in bf16.
    lhs = jnp.concatenate(
        [dialog_sym_rep.reshape(B, -1), sym_mask, dialog_state_,
         jnp.ones((B, 1), jnp.float32)], axis=1).astype(jnp.bfloat16)

    # All remaining per-call masks packed into one lane-concatenated operand.
    masks = jnp.concatenate(
        [jnp.pad(disease_mask, ((0, 0), (0, S - D))), sym_flag, symptoms_mask],
        axis=1)

    # (D, B, S) layout so the kernel can do D unrolled VPU FMAs.
    sym_rwr_dbs = jnp.transpose(sym_rwr, (1, 0, 2))

    vmem = pl.BlockSpec(memory_space=pltpu.MemorySpace.VMEM)
    out = pl.pallas_call(
        kgrl_kernel,
        out_shape=jax.ShapeDtypeStruct((2, B, S), jnp.float32),
        in_specs=[vmem] * 6,
        out_specs=vmem,
    )(lhs, w_fuse, w1b, w2b, masks, sym_rwr_dbs)

    disease_dis = out[0, :, :D]
    symptom_final = out[1]
    return disease_dis, symptom_final


# -------------------------- pure-JAX reference ----------------------------- #
def kgrl_reference(params, dialog_state, dialog_sym_rep, kg_adj, sym_flag,
                   sym_mask, disease_mask, symptoms_mask, sym_rwr):
    ds = dialog_state
    state_o = jnp.where(ds == 1.0, jnp.ones_like(ds), jnp.zeros_like(ds))
    dialog_state_ = jnp.where(ds == -1.0, -jnp.ones_like(ds), state_o)

    graph_rep = jnp.tanh(kg_adj @ params["w_gat"])
    state = jnp.squeeze(dialog_sym_rep @ graph_rep, axis=1)

    logits = sym_mask @ params["w_di"] + params["b_di"]
    disease_ = jax.nn.softmax(logits, axis=-1)
    disease_dis = disease_ * disease_mask

    h_mu = jax.nn.relu(dialog_state_ @ params["w_mu1"] + params["b_mu1"])
    mu = jax.nn.sigmoid(h_mu @ params["w_mu2"] + params["b_mu2"])

    sym_rwr_prob = jnp.squeeze(disease_dis[:, None, :] @ sym_rwr, axis=1)
    sym_rwr_prob = jnp.where(sym_rwr_prob > 0.0,
                             jax.nn.sigmoid(sym_rwr_prob), sym_rwr_prob)

    h_sq = jax.nn.relu(state @ params["w_sq1"] + params["b_sq1"])
    symptom_p = jax.nn.sigmoid(h_sq @ params["w_sq2"] + params["b_sq2"])

    sym_prob = mu * symptom_p + (1.0 - mu) * sym_rwr_prob
    symptom_final = sym_prob * sym_flag * symptoms_mask
    return disease_dis, symptom_final


# --------------------------------- main ------------------------------------ #
if __name__ == "__main__":
    # small shapes consistent with the module's constructor
    B = 2           # batch
    D = 4           # dis_shape  (number of diseases)
    S = 8           # sym_shape  (number of symptoms)
    N = 16          # entity_num (KG nodes)
    E = 16          # embed_size == input_shape (Sym_Inquiry input)
    H = 32          # hidden_size

    key = jax.random.PRNGKey(0)
    keys = jax.random.split(key, 20)

    def init(k, shape, scale=0.1):
        return (scale * jax.random.normal(k, shape)).astype(jnp.float32)

    params = {
        "w_gat": init(keys[0], (N, E)),
        "w_di": init(keys[1], (S, D)),  "b_di": init(keys[2], (1, D)),
        "w_sq1": init(keys[3], (E, H)), "b_sq1": init(keys[4], (1, H)),
        "w_sq2": init(keys[5], (H, S)), "b_sq2": init(keys[6], (1, S)),
        "w_mu1": init(keys[7], (D + S, H)), "b_mu1": init(keys[8], (1, H)),
        "w_mu2": init(keys[9], (H, 1)),     "b_mu2": init(keys[10], (1, 1)),
    }

    # inputs
    dialog_state = jax.random.randint(keys[11], (B, D + S), -1, 2).astype(jnp.float32)
    dialog_sym_rep = init(keys[12], (B, 1, N), scale=1.0)
    kg_adj = (jax.random.uniform(keys[13], (N, N)) > 0.7).astype(jnp.float32)
    sym_flag = (jax.random.uniform(keys[14], (B, S)) > 0.3).astype(jnp.float32)
    sym_mask = (jax.random.uniform(keys[15], (B, S)) > 0.5).astype(jnp.float32)
    disease_mask = (jax.random.uniform(keys[16], (B, D)) > 0.3).astype(jnp.float32)
    symptoms_mask = (jax.random.uniform(keys[17], (B, S)) > 0.2).astype(jnp.float32)

    # TODO(synk): construct_graph() uses networkx PageRank (RWR) per batch
    # element; replaced by a deterministic row-normalized synthetic RWR matrix
    # masked by disease_mask, built in plain JAX outside the kernel.
    base = jax.random.uniform(keys[18], (D, S)).astype(jnp.float32) + 0.1
    base = base / jnp.sum(base, axis=1, keepdims=True)
    sym_rwr = base[None, :, :] * (disease_mask > 0.0).astype(jnp.float32)[:, :, None]

    # once-per-session, batch-invariant packing (hoisted out of the kernel)
    w_fuse, w1b, w2b = pack_session_params(params, kg_adj, num_dis=D, num_sym=S)

    out = kgrl_forward(w_fuse, w1b, w2b, dialog_state, dialog_sym_rep,
                       sym_flag, sym_mask, disease_mask, symptoms_mask, sym_rwr)
    disease_dis, symptom_final = jax.block_until_ready(out)

    ref_dis, ref_sym = kgrl_reference(params, dialog_state, dialog_sym_rep,
                                      kg_adj, sym_flag, sym_mask,
                                      disease_mask, symptoms_mask, sym_rwr)
    # bf16 matmul operands -> looser tolerance than the f32 reference.
    assert jnp.allclose(disease_dis, ref_dis, atol=3e-2, rtol=3e-2)
    assert jnp.allclose(symptom_final, ref_sym, atol=3e-2, rtol=3e-2)

    print("KERNEL_OK")
</pallas_src>

<mosaic_0001>
module attributes {stable_mosaic.version = 11 : i64} {
  func.func @kgrl_kernel(%arg0: memref<2x37xbf16, #tpu.memory_space<vmem>>, %arg1: memref<37x37xbf16, #tpu.memory_space<vmem>>, %arg2: memref<29x65xbf16, #tpu.memory_space<vmem>>, %arg3: memref<65x9xbf16, #tpu.memory_space<vmem>>, %arg4: memref<2x24xf32, #tpu.memory_space<vmem>>, %arg5: memref<4x2x8xf32, #tpu.memory_space<vmem>>, %arg6: memref<2x2x8xf32, #tpu.memory_space<vmem>>) attributes {dimension_semantics = [], scalar_prefetch = 0 : i64, scratch_operands = 0 : i64, tpu.core_type = #tpu.core_type<tc>} {
    %c0 = arith.constant 0 : index
    %c0_0 = arith.constant 0 : index
    %0 = vector.load %arg0[%c0, %c0_0] : memref<2x37xbf16, #tpu.memory_space<vmem>>, vector<2x37xbf16>
    %c0_1 = arith.constant 0 : index
    %c0_2 = arith.constant 0 : index
    %1 = vector.load %arg1[%c0_1, %c0_2] : memref<37x37xbf16, #tpu.memory_space<vmem>>, vector<37x37xbf16>
    %cst = arith.constant dense<0.000000e+00> : vector<2x37xf32>
    %2 = tpu.matmul %0, %1, %cst {dimension_numbers = #tpu.dot_dimension_numbers<[1], [0], [0], [1], [0, 0, 1, 1], [], []>} : vector<2x37xbf16>, vector<37x37xbf16>, vector<2x37xf32> -> vector<2x37xf32>
    %3 = vector.extract_strided_slice %2 {offsets = [0, 0], sizes = [2, 29], strides = [1, 1]} : vector<2x37xf32> to vector<2x29xf32>
    %4 = vector.extract_strided_slice %2 {offsets = [0, 29], sizes = [2, 8], strides = [1, 1]} : vector<2x37xf32> to vector<2x8xf32>
    %cst_3 = arith.constant dense<0xFF800000> : vector<2xf32>
    %5 = vector.multi_reduction <maximumf>, %4, %cst_3 [1] : vector<2x8xf32> to vector<2xf32>
    %6 = vector.shape_cast %5 : vector<2xf32> to vector<2x1xf32>
    %7 = vector.broadcast %6 : vector<2x1xf32> to vector<2x8xf32>
    %8 = arith.subf %4, %7 : vector<2x8xf32>
    %9 = math.exp %8 : vector<2x8xf32>
    %cst_4 = arith.constant dense<0.000000e+00> : vector<2xf32>
    %10 = vector.multi_reduction <add>, %9, %cst_4 [1] : vector<2x8xf32> to vector<2xf32>
    %11 = vector.shape_cast %10 : vector<2xf32> to vector<2x1xf32>
    %12 = tpu.reciprocal %11 {approx = true} : vector<2x1xf32> -> vector<2x1xf32>
    %13 = vector.broadcast %12 : vector<2x1xf32> to vector<2x8xf32>
    %14 = arith.mulf %9, %13 : vector<2x8xf32>
    %c0_5 = arith.constant 0 : index
    %c0_6 = arith.constant 0 : index
    %15 = vector.load %arg4[%c0_5, %c0_6] : memref<2x24xf32, #tpu.memory_space<vmem>>, vector<2x24xf32>
    %16 = vector.extract_strided_slice %15 {offsets = [0, 0], sizes = [2, 8], strides = [1, 1]} : vector<2x24xf32> to vector<2x8xf32>
    %17 = arith.mulf %14, %16 : vector<2x8xf32>
    %cst_7 = arith.constant 0.000000e+00 : f32
    %18 = vector.broadcast %cst_7 : f32 to vector<2x8xf32>
    %19 = vector.extract_strided_slice %17 {offsets = [0, 0], sizes = [2, 1], strides = [1, 1]} : vector<2x8xf32> to vector<2x1xf32>
    %c0_8 = arith.constant 0 : index
    %c0_9 = arith.constant 0 : index
    %c0_10 = arith.constant 0 : index
    %20 = vector.load %arg5[%c0_8, %c0_9, %c0_10] : memref<4x2x8xf32, #tpu.memory_space<vmem>>, vector<1x2x8xf32>
    %21 = vector.shape_cast %20 : vector<1x2x8xf32> to vector<2x8xf32>
    %22 = vector.broadcast %19 : vector<2x1xf32> to vector<2x8xf32>
    %23 = arith.mulf %22, %21 : vector<2x8xf32>
    %24 = arith.addf %18, %23 : vector<2x8xf32>
    %25 = vector.extract_strided_slice %17 {offsets = [0, 1], sizes = [2, 1], strides = [1, 1]} : vector<2x8xf32> to vector<2x1xf32>
    %c1 = arith.constant 1 : index
    %c0_11 = arith.constant 0 : index
    %c0_12 = arith.constant 0 : index
    %26 = vector.load %arg5[%c1, %c0_11, %c0_12] : memref<4x2x8xf32, #tpu.memory_space<vmem>>, vector<1x2x8xf32>
    %27 = vector.shape_cast %26 : vector<1x2x8xf32> to vector<2x8xf32>
    %28 = vector.broadcast %25 : vector<2x1xf32> to vector<2x8xf32>
    %29 = arith.mulf %28, %27 : vector<2x8xf32>
    %30 = arith.addf %24, %29 : vector<2x8xf32>
    %31 = vector.extract_strided_slice %17 {offsets = [0, 2], sizes = [2, 1], strides = [1, 1]} : vector<2x8xf32> to vector<2x1xf32>
    %c2 = arith.constant 2 : index
    %c0_13 = arith.constant 0 : index
    %c0_14 = arith.constant 0 : index
    %32 = vector.load %arg5[%c2, %c0_13, %c0_14] : memref<4x2x8xf32, #tpu.memory_space<vmem>>, vector<1x2x8xf32>
    %33 = vector.shape_cast %32 : vector<1x2x8xf32> to vector<2x8xf32>
    %34 = vector.broadcast %31 : vector<2x1xf32> to vector<2x8xf32>
    %35 = arith.mulf %34, %33 : vector<2x8xf32>
    %36 = arith.addf %30, %35 : vector<2x8xf32>
    %37 = vector.extract_strided_slice %17 {offsets = [0, 3], sizes = [2, 1], strides = [1, 1]} : vector<2x8xf32> to vector<2x1xf32>
    %c3 = arith.constant 3 : index
    %c0_15 = arith.constant 0 : index
    %c0_16 = arith.constant 0 : index
    %38 = vector.load %arg5[%c3, %c0_15, %c0_16] : memref<4x2x8xf32, #tpu.memory_space<vmem>>, vector<1x2x8xf32>
    %39 = vector.shape_cast %38 : vector<1x2x8xf32> to vector<2x8xf32>
    %40 = vector.broadcast %37 : vector<2x1xf32> to vector<2x8xf32>
    %41 = arith.mulf %40, %39 : vector<2x8xf32>
    %42 = arith.addf %36, %41 : vector<2x8xf32>
    %cst_17 = arith.constant 0.000000e+00 : f32
    %43 = vector.broadcast %cst_17 : f32 to vector<2x8xf32>
    %44 = arith.cmpf ogt, %42, %43 : vector<2x8xf32>
    %45 = arith.negf %42 : vector<2x8xf32>
    %46 = math.exp %45 : vector<2x8xf32>
    %cst_18 = arith.constant 1.000000e+00 : f32
    %47 = vector.broadcast %cst_18 : f32 to vector<2x8xf32>
    %48 = arith.addf %47, %46 : vector<2x8xf32>
    %49 = arith.divf %47, %48 : vector<2x8xf32>
    %50 = arith.select %44, %49, %42 : vector<2x8xi1>, vector<2x8xf32>
    %51 = arith.truncf %3 : vector<2x29xf32> to vector<2x29xbf16>
    %c0_19 = arith.constant 0 : index
    %c0_20 = arith.constant 0 : index
    %52 = vector.load %arg2[%c0_19, %c0_20] : memref<29x65xbf16, #tpu.memory_space<vmem>>, vector<29x65xbf16>
    %cst_21 = arith.constant dense<0.000000e+00> : vector<2x65xf32>
    %53 = tpu.matmul %51, %52, %cst_21 {dimension_numbers = #tpu.dot_dimension_numbers<[1], [0], [0], [1], [0, 0, 1, 1], [], []>} : vector<2x29xbf16>, vector<29x65xbf16>, vector<2x65xf32> -> vector<2x65xf32>
    %cst_22 = arith.constant 0.000000e+00 : f32
    %54 = vector.broadcast %cst_22 : f32 to vector<2x65xf32>
    %55 = arith.maximumf %53, %54 : vector<2x65xf32>
    %56 = arith.truncf %55 : vector<2x65xf32> to vector<2x65xbf16>
    %c0_23 = arith.constant 0 : index
    %c0_24 = arith.constant 0 : index
    %57 = vector.load %arg3[%c0_23, %c0_24] : memref<65x9xbf16, #tpu.memory_space<vmem>>, vector<65x9xbf16>
    %cst_25 = arith.constant dense<0.000000e+00> : vector<2x9xf32>
    %58 = tpu.matmul %56, %57, %cst_25 {dimension_numbers = #tpu.dot_dimension_numbers<[1], [0], [0], [1], [0, 0, 1, 1], [], []>} : vector<2x65xbf16>, vector<65x9xbf16>, vector<2x9xf32> -> vector<2x9xf32>
    %59 = arith.negf %58 : vector<2x9xf32>
    %60 = math.exp %59 : vector<2x9xf32>
    %cst_26 = arith.constant 1.000000e+00 : f32
    %61 = vector.broadcast %cst_26 : f32 to vector<2x9xf32>
    %62 = arith.addf %61, %60 : vector<2x9xf32>
    %63 = arith.divf %61, %62 : vector<2x9xf32>
    %64 = vector.extract_strided_slice %63 {offsets = [0, 0], sizes = [2, 8], strides = [1, 1]} : vector<2x9xf32> to vector<2x8xf32>
    %65 = vector.extract_strided_slice %63 {offsets = [0, 8], sizes = [2, 1], strides = [1, 1]} : vector<2x9xf32> to vector<2x1xf32>
    %66 = vector.broadcast %65 : vector<2x1xf32> to vector<2x8xf32>
    %67 = arith.mulf %66, %64 : vector<2x8xf32>
    %cst_27 = arith.constant 1.000000e+00 : f32
    %68 = vector.broadcast %cst_27 : f32 to vector<2x1xf32>
    %69 = arith.subf %68, %65 : vector<2x1xf32>
    %70 = vector.broadcast %69 : vector<2x1xf32> to vector<2x8xf32>
    %71 = arith.mulf %70, %50 : vector<2x8xf32>
    %72 = arith.addf %67, %71 : vector<2x8xf32>
    %73 = vector.extract_strided_slice %15 {offsets = [0, 8], sizes = [2, 8], strides = [1, 1]} : vector<2x24xf32> to vector<2x8xf32>
    %74 = arith.mulf %72, %73 : vector<2x8xf32>
    %75 = vector.extract_strided_slice %15 {offsets = [0, 16], sizes = [2, 8], strides = [1, 1]} : vector<2x24xf32> to vector<2x8xf32>
    %76 = arith.mulf %74, %75 : vector<2x8xf32>
    %c0_28 = arith.constant 0 : index
    %c0_29 = arith.constant 0 : index
    %c0_30 = arith.constant 0 : index
    %77 = vector.load %arg6[%c0_28, %c0_29, %c0_30] : memref<2x2x8xf32, #tpu.memory_space<vmem>>, vector<1x2x8xf32>
    %78 = vector.shape_cast %77 : vector<1x2x8xf32> to vector<2x8xf32>
    %79 = vector.shape_cast %17 : vector<2x8xf32> to vector<1x2x8xf32>
    tpu.vector_store %arg6[%c0_28, %c0_29, %c0_30], %79 {strides = array<i32>} : memref<2x2x8xf32, #tpu.memory_space<vmem>>, vector<1x2x8xf32>,
    %c1_31 = arith.constant 1 : index
    %c0_32 = arith.constant 0 : index
    %c0_33 = arith.constant 0 : index
    %80 = vector.load %arg6[%c1_31, %c0_32, %c0_33] : memref<2x2x8xf32, #tpu.memory_space<vmem>>, vector<1x2x8xf32>
    %81 = vector.shape_cast %80 : vector<1x2x8xf32> to vector<2x8xf32>
    %82 = vector.shape_cast %76 : vector<2x8xf32> to vector<1x2x8xf32>
    tpu.vector_store %arg6[%c1_31, %c0_32, %c0_33], %82 {strides = array<i32>} : memref<2x2x8xf32, #tpu.memory_space<vmem>>, vector<1x2x8xf32>,
    return
  }
}

</mosaic_0001>

<bundles_post_ra>
// kernel: kgrl_forward.1
= control target key start
LH: loop header
LB: loop body
LE: loop exit
PB: predicated region body
PF: predicated region fallthrough
CT: control target
= control target key end

     0   :  { %vm49_vm0 = vcmask 1041408   ;;  %vm50_vm1 = vcmask 1042432   ;;  %v457_v0 = vmov 0.0   ;;  %v458_v2 = vmov 65535   ;;  %s461_s16 = smov 99   ;;  %s462_s18 = smov 29   ;;  %s564_s1 = inlined_call_operand.vmem [shape: bf16[37,37], index: 1, kind: input, shape index: {}]   ;;  %s565_s2 = inlined_call_operand.vmem [shape: bf16[29,65], index: 2, kind: input, shape index: {}]   ;;  %s566_s0 = inlined_call_operand.vmem [shape: bf16[2,37], index: 0, kind: input, shape index: {}]   ;;  %s567_s3 = inlined_call_operand.vmem [shape: bf16[65,9], index: 3, kind: input, shape index: {}]   ;;  %s568_s4 = inlined_call_operand.vmem [shape: f32[2,24], index: 4, kind: input, shape index: {}]   ;;  %s569_s5 = inlined_call_operand.vmem [shape: f32[4,2,8], index: 5, kind: input, shape index: {}]   ;;  %s570_s6 = inlined_call_operand.vmem [shape: f32[2,2,8], index: 6, kind: output, shape index: {}]  }
   0x1   :  { %384 = vmatprep.subr.bf16.mxu0 %v457_v0  ;;  %v435_v1 = vld [vmem:[%s564_s1] sm:$0xff]   ;;  %v51_v3 = vsel %vm49_vm0, 4294967295, %v458_v2  ;;  %402 = vmatprep.subr.bf16.mxu1 %v457_v0  ;;  %v436_v4 = vld [vmem:[%s564_s1 + $0x8] sm:$0xff]   ;;  %v437_v5 = vld [vmem:[%s564_s1 + $0x10] ss:$0 sps:$4 sm:$0x77]  }
   0x2   :  { %385 = vmatpush3.bf16.msra.mxu0 %v435_v1  ;;  %v52_v6 = vsel %vm50_vm1, %v51_v3, 0  ;;  %vm459_vm2 = vmmov 0   ;;  %v24_v8 = vld [vmem:[%s566_s0] sm:$0x1]  ;;  %vm45_vm3 = vcmask 302080   ;;  %vm179_vm4 = vcmask 1045504  }
   0x3   :  { %386 = vmatprep.subr.bf16.mxu0 %v457_v0  ;;  %390 = vmatprep.mubr.msk.bf16.mxu0 %vm459_vm2, %v457_v0  ;;  %v54_v7 = vand.u32 %v437_v5, %v52_v6  ;;  %v438_v9 = vld [vmem:[%s565_s2] sm:$0xff]   ;;  %v181_v10 = vsel %vm179_vm4, 4294967295, %v458_v2  ;;  %v439_v11 = vld [vmem:[%s565_s2 + $0x8] sm:$0x7f]   ;;  %vm180_vm5 = vcmask 1046528   ;;  %vm96_vm6 = vcmask 296168  }
   0x4   :  { %412 = vmatprep.mubr.msk.bf16.mxu1 %vm459_vm2, %v457_v0  ;;  %v182_v12 = vsel %vm180_vm5, %v181_v10, 0  ;;  %vm175_vm7 = vcmask 236544   ;;  %v440_v20 = vld [vmem:[%s567_s3] sm:$0xff]   ;;  %v441_v21 = vld [vmem:[%s567_s3 + $0x8] sm:$0xff]   ;;  %v442_v22 = vld [vmem:[%s567_s3 + $0x10] sm:$0xff]   ;;  %vm268_vm8 = vcmask 1040384  }
   0x5   :  { %v184_v13 = vand.u32 %v439_v11, %v182_v12  ;;  %403 = vmatpush3.bf16.msra.mxu1 %v440_v20  ;;  %v443_v23 = vld [vmem:[%s567_s3 + $0x18] sm:$0xff]   ;;  %v444_v24 = vld [vmem:[%s567_s3 + $0x20] ss:$0 sps:$4 sm:$0x11]   ;;  %v460_v25 = vmov 0   ;;  %vm264_vm9 = vcmask 531456  }
   0x6   :  { %387 = vmatpush3.bf16.msra.mxu0 %v436_v4  ;;  %404 = vmatprep.subr.bf16.mxu1 %v457_v0  ;;  %v270_v26 = vsel %vm268_vm8, 65535, %v460_v25  ;;  %vm107_vm10 = vcmask 58368   ;;  %v113_v40 = vld [vmem:[%s568_s4] sm:$0x3]  ;;  %v463_v41 = vmov 31   ;;  %v464_v42 = vmov 29  }
   0x7   :  { %388 = vmatprep.subr.bf16.mxu0 %v457_v0  ;;  %v272_v27 = vand.u32 %v444_v24, %v270_v26  ;;  %431 = vset.pattern.permute.xlu0 %v463_v41  ;;  %v465_v53 = vmov 30   ;;  %v466_v54 = vmov 8   ;;  %v467_v55 = vmov 32   ;;  %s468_s4 = smov 120   ;;  %s469_s19 = smov 112  }
   0x8   :  { %429 = vset.pattern.permute.xlu1 %v464_v42  ;;  %v119_v61 = vld [vmem:[%s569_s5] sm:$0x3]  ;;  %v356_v62 = vld [vmem:[%s569_s5 + $0x2] sm:$0x3]  ;;  %v357_v63 = vld [vmem:[%s569_s5 + $0x4] sm:$0x3] }
   0x9   :  { %405 = vmatpush3.bf16.msra.mxu1 %v441_v21  ;;  %v358_v6 = vld [vmem:[%s569_s5 + $0x6] sm:$0x3] }
   0xa   :  { %389 = vmatpush3.bf16.msra.mxu0 %v54_v7  ;;  %406 = vmatprep.subr.bf16.mxu1 %v457_v0 }
   0xb   :  { %394 = vmatprep.subr.bf16.mxu0 %v457_v0 }
   0xd   :  { %391 = vmatmul.mubr.msk.bf16.vlgmr.msra.gmra.mrb[0].mxu0 %vm45_vm3, %v24_v8  ;;  %407 = vmatpush3.bf16.msra.mxu1 %v442_v22 }
   0xe   :  { %395 = vmatpush3.bf16.msra.mxu0 %v438_v9  ;;  %398 = vmatprep.mubr.msk.bf16.mxu0 %vm459_vm2, %v457_v0 }
   0xf   :  { %396 = vmatprep.subr.bf16.mxu0 %v457_v0  ;;  %408 = vmatprep.subr.bf16.mxu1 %v457_v0 }
  0x11   :  { %409 = vmatpush3.bf16.msra.mxu1 %v443_v23 }
  0x12   :  { %397 = vmatpush3.bf16.msra.mxu0 %v184_v13  ;;  %410 = vmatprep.subr.bf16.mxu1 %v457_v0 }
  0x15   :  { %411 = vmatpush3.bf16.msra.mxu1 %v272_v27 }
  0xe0   :  { %v90_v14 = vpop.f32.mrb[0].mxu0 }
  0xe1   :  { %v159_v15 = vpack.c.bf16 %v90_v14, %v90_v14  ;;  %v392_v16 = vpop.f32.mrb[1].mxu0  ;;  %v97_v17 = vsel %vm96_vm6, %v90_v14, -inf }
  0xe2   :  { %98 = vmax.xlane.f32.xlu0 %v97_v17  ;;  %v93_v18 = vpop.f32.mrb[2].mxu0 }
  0xe3   :  { %v393_v19 = vpop.f32.mrb[3].mxu0  ;;  %399 = vmatmul.mubr.msk.bf16.vlgmr.msra.gmra.mrb[4].mxu0 %vm175_vm7, %v159_v15 }
 0x16f   :  { %v99_v28 = vpop.xlane.xlu0 %98 }
 0x170   :  { %v100_v29 = vsub.f32 %v90_v14, %v99_v28 }
 0x172   :  { %v101_v30 = vmul.f32 1.442695, %v100_v29 }
 0x174   :  { %445 = vpow2.f32 %v101_v30 }
 0x17e   :  { %v446_v31 = vpop.eup %445 }
 0x17f   :  { %104 = vrot.lane.b32.xlu0 %v446_v31, %s461_s16 }
 0x1b6   :  { %v220_v32 = vpop.f32.mrb[4].mxu0 }
 0x1b7   :  { %v226_v33 = vmax.f32 %v220_v32, 0.0  ;;  %v400_v34 = vpop.f32.mrb[5].mxu0 }
 0x1b8   :  { %v223_v35 = vpop.f32.mrb[6].mxu0 }
 0x1b9   :  { %v227_v36 = vpack.c.bf16 %v226_v33, %v226_v33  ;;  %v401_v37 = vpop.f32.mrb[7].mxu0 }
 0x1bb   :  { %413 = vmatmul.mubr.msk.bf16.vlgmr.msra.gmra.mrb[0].mxu1 %vm264_vm9, %v227_v36 }
 0x1f1   :  { %v105_v38 = vpop.permute.xlu0 %104 }
 0x1f2   :  { %v108_v39 = vsel %vm107_vm10, %v105_v38, 0.0 }
 0x1f3   :  { %109 = vadd.xlane.f32.xlu1 %v108_v39 }
 0x204   :  { %115 = vrot.lane.b32.xlu1 %v113_v40, %s462_s18 }
 0x280   :  { %v110_v43 = vpop.xlane.xlu1 %109 }
 0x281   :  { %447 = vrcp.f32 %v110_v43 }
 0x284   :  { %v116_v45 = vpop.permute.xlu1 %115 }
 0x28b   :  { %v448_v44 = vpop.eup %447 }
 0x28c   :  { %v112_v46 = vmul.f32 %v448_v44, %v446_v31 }
 0x28e   :  { %v118_v47 = vmul.f32 %v116_v45, %v112_v46  ;;  %v308_v48 = vpop.f32.mrb[0].mxu1 }
 0x28f   :  { %v369_v49 = vmul.f32 -1.442695, %v308_v48  ;;  %v414_v50 = vpop.f32.mrb[1].mxu1 }
 0x290   :  { %138 = vperm.xlu0 %431, %v118_v47   ;;  %122 = vperm.xlu1 %429, %v118_v47   ;;  %v311_v51 = vpop.f32.mrb[2].mxu1 }
 0x291   :  { %449 = vpow2.f32 %v369_v49  ;;  %v415_v52 = vpop.f32.mrb[3].mxu1 }
 0x294   :  { %430 = vset.pattern.permute.xlu1 %v465_v53  ;;  %434 = vset.pattern.permute.xlu0 %v466_v54 }
 0x295   :  { %130 = vperm.xlu1 %430, %v118_v47  }
 0x299   :  { %432 = vset.pattern.permute.xlu1 %v467_v55 }
 0x29a   :  { %146 = vperm.xlu1 %432, %v118_v47  }
 0x29b   :  { %v450_v56 = vpop.eup %449 }
 0x29c   :  { %v317_v57 = vadd.f32 1.0, %v450_v56 }
 0x29e   :  { %451 = vrcp.f32 %v317_v57  ;;  %433 = vset.pattern.permute.xlu1 %v466_v54 }
 0x2a8   :  { %v452_v58 = vpop.eup %451 }
 0x2a9   :  { %322 = vperm.xlu1 %433, %v452_v58   ;;  %v326_v59 = vsub.f32 1.0, %v452_v58 }
 0x2ab   :  { %329 = vperm.xlu0 %434, %v326_v59  }
 0x2ad   :  { %334 = vrot.lane.b32.xlu1 %v113_v40, %s468_s4 }
 0x2af   :  { %342 = vrot.lane.b32.xlu0 %v118_v47, %s461_s16 }
 0x2b1   :  { %338 = vrot.lane.b32.xlu1 %v113_v40, %s469_s19 }
 0x30f   :  { %v123_v60 = vpop.permute.xlu1 %122  ;;  %v139_v0 = vpop.permute.xlu0 %138 }
 0x310   :  { %v125_v2 = vmul.f32 %v123_v60, %v119_v61  ;;  %v141_v4 = vmul.f32 %v357_v63, %v139_v0 }
 0x314   :  { %v131_v1 = vpop.permute.xlu1 %130 }
 0x315   :  { %v133_v3 = vmul.f32 %v356_v62, %v131_v1 }
 0x317   :  { %v134_v5 = vadd.f32 %v133_v3, %v125_v2 }
 0x319   :  { %v142_v7 = vadd.f32 %v141_v4, %v134_v5  ;;  %v147_v8 = vpop.permute.xlu1 %146 }
 0x31a   :  { %v149_v9 = vmul.f32 %v358_v6, %v147_v8 }
 0x31c   :  { %v150_v10 = vadd.f32 %v149_v9, %v142_v7 }
 0x31e   :  { %v359_v11 = vmul.f32 -1.442695, %v150_v10  ;;  %vm151_vm11 = vcmp.gt.f32.partialorder %v150_v10, 0.0 }
 0x320   :  { %453 = vpow2.f32 %v359_v11 }
 0x328   :  { %v323_v16 = vpop.permute.xlu1 %322 }
 0x329   :  { %v325_v20 = vmul.f32 %v452_v58, %v323_v16 }
 0x32a   :  { %v454_v12 = vpop.eup %453  ;;  %v330_v13 = vpop.permute.xlu0 %329 }
 0x32b   :  { %v155_v14 = vadd.f32 1.0, %v454_v12 }
 0x32c   :  { %v335_v17 = vpop.permute.xlu1 %334 }
 0x32d   :  { %455 = vrcp.f32 %v155_v14 }
 0x32e   :  { %v343_v15 = vpop.permute.xlu0 %342 }
 0x32f   :  { %345 = vst.msk [vmem:[%s570_s6] sm:$0x3] %vm107_vm10, %v343_v15 }
 0x330   :  { %v339_v23 = vpop.permute.xlu1 %338 }
 0x337   :  { %v456_v18 = vpop.eup %455 }
 0x338   :  { %v158_v19 = vsel %vm151_vm11, %v456_v18, %v150_v10 }
 0x339   :  { %v332_v21 = vmul.f32 %v330_v13, %v158_v19 }
 0x33b   :  { %v333_v22 = vadd.f32 %v332_v21, %v325_v20 }
 0x33d   :  { %v337_v24 = vmul.f32 %v335_v17, %v333_v22 }
 0x33f   :  { %v341_v25 = vmul.f32 %v339_v23, %v337_v24 }
 0x341   :  { %370 = vst.msk [vmem:[%s570_s6 + $0x2] sm:$0x3] %vm107_vm10, %v341_v25 }

</bundles_post_ra>
